<compile_context>
chip_gen: v7x
topology: tpu7x:2x2x1
jax: 0.10.0
libtpu: 0.0.40
codegen_flags: <defaults>
</compile_context>

<pallas_src>
import jax
import jax.numpy as jnp
from jax.experimental import pallas as pl
from jax.experimental.pallas import tpu as pltpu


def _dice_stats_kernel(preds_ref, labels_ref, inter_ref, psum_ref, lsum_ref):
    # preds_ref : (B, C, S_TILE)  native dtype (f32 / bf16 / ...)
    # labels_ref: (B, 1, S_TILE)  native dtype (f32 / int8 / bool)
    # inter_ref, psum_ref : (1, B, C) f32 -- resident across the inner S axis
    # lsum_ref            : (1, B, 1) f32 -- resident across the inner S axis
    k = pl.program_id(1)

    @pl.when(k == 0)
    def _():
        inter_ref[...] = jnp.zeros_like(inter_ref)
        psum_ref[...] = jnp.zeros_like(psum_ref)
        lsum_ref[...] = jnp.zeros_like(lsum_ref)

    # Cast to f32 only once the tile is in VMEM (keeps the HBM stream narrow).
    x = preds_ref[...].astype(jnp.float32)            # (B, C, T)
    lab = labels_ref[...].astype(jnp.float32)         # (B, 1, T)

    # Numerically stable softmax over the class axis (dim=1), normalized with a
    # single broadcast reciprocal instead of a full (B, C, T) divide.
    m = jnp.max(x, axis=1, keepdims=True)              # (B, 1, T)
    e = jnp.exp(x - m)                                 # (B, C, T)
    denom = jnp.sum(e, axis=1, keepdims=True)          # (B, 1, T), >= 1
    inv = pl.reciprocal(denom, approx=True)            # EUP approx
    inv = inv * (2.0 - denom * inv)                    # one Newton step -> ~f32
    p = e * inv                                        # softmax(x, axis=1)

    inter_ref[...] += jnp.sum(p * lab, axis=-1)[None]  # (1, B, C)
    psum_ref[...] += jnp.sum(p, axis=-1)[None]         # (1, B, C)
    lsum_ref[...] += jnp.sum(lab, axis=-1)[None]       # (1, B, 1)


def _choose_tiling(S, target_tile=2048, max_parallel=2):
    """Pick (P, K, S_TILE) so every block's last dim is a multiple of 128
    (or the full S), S_TILE divides S//P exactly, and P feeds both v7x cores."""
    if S % 128 != 0:
        # Fallback: single whole-S block (last dim == full array dim is legal).
        return 1, 1, S
    P = max_parallel if (S // 128) % max_parallel == 0 else 1
    s_split = S // P
    tile = min(s_split, target_tile)
    tile = (tile // 128) * 128
    while s_split % tile != 0:          # terminates: 128 always divides s_split
        tile -= 128
    return P, s_split // tile, tile


def dice_loss(preds, labels, smooth=1.0, weights=None, target_tile=2048):
    """Pallas implementation of DiceLoss.forward(preds, labels)."""
    B, C, H, W = preds.shape
    S = H * W

    # Reshape only -- no dtype up-cast here (the kernel casts in VMEM).
    preds_r = preds.reshape(B, C, S)
    labels_r = labels.reshape(B, 1, S)

    P, K, T = _choose_tiling(S, target_tile)

    inter_p, psum_p, lsum_p = pl.pallas_call(
        _dice_stats_kernel,
        out_shape=(
            jax.ShapeDtypeStruct((P, B, C), jnp.float32),
            jax.ShapeDtypeStruct((P, B, C), jnp.float32),
            jax.ShapeDtypeStruct((P, B, 1), jnp.float32),
        ),
        grid=(P, K),
        in_specs=[
            pl.BlockSpec((B, C, T), lambda p, k: (0, 0, p * K + k)),
            pl.BlockSpec((B, 1, T), lambda p, k: (0, 0, p * K + k)),
        ],
        out_specs=(
            pl.BlockSpec((1, B, C), lambda p, k: (p, 0, 0)),
            pl.BlockSpec((1, B, C), lambda p, k: (p, 0, 0)),
            pl.BlockSpec((1, B, 1), lambda p, k: (p, 0, 0)),
        ),
        compiler_params=pltpu.CompilerParams(
            dimension_semantics=("parallel", "arbitrary")),
    )(preds_r, labels_r)

    # Combine the P parallel partial reductions (tiny (P, B, C) arrays).
    inter = inter_p.sum(axis=0)                    # (B, C)
    psum = psum_p.sum(axis=0)                      # (B, C)
    labels_sum = lsum_p.sum(axis=0).reshape(B)     # (B,), torch's labels.sum(-1)

    # Exactly mirrors the PyTorch lines (same broadcasting semantics; the
    # (B,C)+(B,) add is the module's own quirk and needs C == B or B == 1).
    dice = (2.0 * inter + smooth) / (psum + labels_sum + smooth)
    if weights is not None:
        dice = dice * weights
    return 1.0 - dice.mean()


def _dice_loss_ref(preds, labels, smooth=1.0, weights=None):
    """Pure-JAX reference mirroring the PyTorch module line by line."""
    B, C = preds.shape[0], preds.shape[1]
    p = preds.reshape(B, C, -1).astype(jnp.float32)
    l = labels.reshape(B, -1).astype(jnp.float32)
    p = jax.nn.softmax(p, axis=1)
    intersection = jnp.sum(p * l[:, None, :], axis=-1)
    preds_sum = jnp.sum(p, axis=-1)
    labels_sum = jnp.sum(l, axis=-1)
    dice = (2.0 * intersection + smooth) / (preds_sum + labels_sum + smooth)
    if weights is not None:
        dice = dice * weights
    return 1.0 - dice.mean()


if __name__ == "__main__":
    # The module's (preds_sum + labels_sum) broadcast requires C == B (or B==1);
    # we reproduce that, so B == C here.
    B, C, H, W = 4, 4, 16, 16
    key = jax.random.PRNGKey(0)
    kp, kl = jax.random.split(key)

    preds = jax.random.normal(kp, (B, C, H, W), dtype=jnp.float32)
    labels = (jax.random.uniform(kl, (B, H, W)) > 0.5).astype(jnp.float32)

    # Deterministic optional per-class weights (module default is None).
    weights = jnp.linspace(0.5, 1.5, C, dtype=jnp.float32)

    loss = jax.block_until_ready(dice_loss(preds, labels, smooth=1.0))
    loss_w = jax.block_until_ready(
        dice_loss(preds, labels, smooth=1.0, weights=weights))

    ref = _dice_loss_ref(preds, labels, smooth=1.0)
    ref_w = _dice_loss_ref(preds, labels, smooth=1.0, weights=weights)

    assert jnp.allclose(loss, ref, atol=1e-5), (loss, ref)
    assert jnp.allclose(loss_w, ref_w, atol=1e-5), (loss_w, ref_w)

    print("KERNEL_OK")
</pallas_src>

<mosaic_0001>
module attributes {stable_mosaic.version = 11 : i64} {
  func.func @_dice_stats_kernel(%arg0: i32, %arg1: i32, %arg2: memref<4x4x128xf32, #tpu.memory_space<vmem>>, %arg3: memref<4x1x128xf32, #tpu.memory_space<vmem>>, %arg4: memref<1x4x4xf32, #tpu.memory_space<vmem>>, %arg5: memref<1x4x4xf32, #tpu.memory_space<vmem>>, %arg6: memref<1x4x1xf32, #tpu.memory_space<vmem>>) attributes {dimension_semantics = [#tpu.dimension_semantics<parallel>, #tpu.dimension_semantics<arbitrary>], iteration_bounds = array<i64: 2, 1>, scalar_prefetch = 0 : i64, scratch_operands = 0 : i64, tpu.core_type = #tpu.core_type<tc>, window_params = [{transform_indices = @transform_0, window_bounds = array<i64: 4, 4, 128>}, {transform_indices = @transform_1, window_bounds = array<i64: 4, 1, 128>}, {transform_indices = @transform_2, window_bounds = array<i64: 1, 4, 4>}, {transform_indices = @transform_3, window_bounds = array<i64: 1, 4, 4>}, {transform_indices = @transform_4, window_bounds = array<i64: 1, 4, 1>}]} {
    %c0_i32 = arith.constant 0 : i32
    %0 = arith.cmpi eq, %arg1, %c0_i32 : i32
    %1 = arith.extui %0 : i1 to i32
    %c0_i32_0 = arith.constant 0 : i32
    %2 = arith.cmpi ne, %1, %c0_i32_0 : i32
    scf.if %2 {
      %cst_29 = arith.constant 0.000000e+00 : f32
      %36 = vector.broadcast %cst_29 : f32 to vector<1x4x4xf32>
      %c0_30 = arith.constant 0 : index
      %c0_31 = arith.constant 0 : index
      %c0_32 = arith.constant 0 : index
      %37 = vector.load %arg4[%c0_30, %c0_31, %c0_32] : memref<1x4x4xf32, #tpu.memory_space<vmem>>, vector<1x4x4xf32>
      tpu.vector_store %arg4[%c0_30, %c0_31, %c0_32], %36 {strides = array<i32>} : memref<1x4x4xf32, #tpu.memory_space<vmem>>, vector<1x4x4xf32>,
      %cst_33 = arith.constant 0.000000e+00 : f32
      %38 = vector.broadcast %cst_33 : f32 to vector<1x4x4xf32>
      %c0_34 = arith.constant 0 : index
      %c0_35 = arith.constant 0 : index
      %c0_36 = arith.constant 0 : index
      %39 = vector.load %arg5[%c0_34, %c0_35, %c0_36] : memref<1x4x4xf32, #tpu.memory_space<vmem>>, vector<1x4x4xf32>
      tpu.vector_store %arg5[%c0_34, %c0_35, %c0_36], %38 {strides = array<i32>} : memref<1x4x4xf32, #tpu.memory_space<vmem>>, vector<1x4x4xf32>,
      %cst_37 = arith.constant 0.000000e+00 : f32
      %40 = vector.broadcast %cst_37 : f32 to vector<1x4x1xf32>
      %c0_38 = arith.constant 0 : index
      %c0_39 = arith.constant 0 : index
      %c0_40 = arith.constant 0 : index
      %41 = vector.load %arg6[%c0_38, %c0_39, %c0_40] : memref<1x4x1xf32, #tpu.memory_space<vmem>>, vector<1x4x1xf32>
      tpu.vector_store %arg6[%c0_38, %c0_39, %c0_40], %40 {strides = array<i32>} : memref<1x4x1xf32, #tpu.memory_space<vmem>>, vector<1x4x1xf32>,
    } else {
    }
    %c0 = arith.constant 0 : index
    %c0_1 = arith.constant 0 : index
    %c0_2 = arith.constant 0 : index
    %3 = vector.load %arg2[%c0, %c0_1, %c0_2] : memref<4x4x128xf32, #tpu.memory_space<vmem>>, vector<4x4x128xf32>
    %c0_3 = arith.constant 0 : index
    %c0_4 = arith.constant 0 : index
    %c0_5 = arith.constant 0 : index
    %4 = vector.load %arg3[%c0_3, %c0_4, %c0_5] : memref<4x1x128xf32, #tpu.memory_space<vmem>>, vector<4x1x128xf32>
    %cst = arith.constant dense<0xFF800000> : vector<4x128xf32>
    %5 = vector.multi_reduction <maximumf>, %3, %cst [1] : vector<4x4x128xf32> to vector<4x128xf32>
    %6 = vector.shape_cast %5 : vector<4x128xf32> to vector<4x1x128xf32>
    %7 = vector.broadcast %6 : vector<4x1x128xf32> to vector<4x4x128xf32>
    %8 = arith.subf %3, %7 : vector<4x4x128xf32>
    %9 = math.exp %8 : vector<4x4x128xf32>
    %cst_6 = arith.constant dense<0.000000e+00> : vector<4x128xf32>
    %10 = vector.multi_reduction <add>, %9, %cst_6 [1] : vector<4x4x128xf32> to vector<4x128xf32>
    %11 = vector.shape_cast %10 : vector<4x128xf32> to vector<4x1x128xf32>
    %12 = tpu.reciprocal %11 {approx = true} : vector<4x1x128xf32> -> vector<4x1x128xf32>
    %13 = arith.mulf %11, %12 : vector<4x1x128xf32>
    %cst_7 = arith.constant 2.000000e+00 : f32
    %14 = vector.broadcast %cst_7 : f32 to vector<4x1x128xf32>
    %15 = arith.subf %14, %13 : vector<4x1x128xf32>
    %16 = arith.mulf %12, %15 : vector<4x1x128xf32>
    %17 = vector.broadcast %16 : vector<4x1x128xf32> to vector<4x4x128xf32>
    %18 = arith.mulf %9, %17 : vector<4x4x128xf32>
    %c0_8 = arith.constant 0 : index
    %c0_9 = arith.constant 0 : index
    %c0_10 = arith.constant 0 : index
    %19 = vector.load %arg4[%c0_8, %c0_9, %c0_10] : memref<1x4x4xf32, #tpu.memory_space<vmem>>, vector<1x4x4xf32>
    %20 = vector.broadcast %4 : vector<4x1x128xf32> to vector<4x4x128xf32>
    %21 = arith.mulf %18, %20 : vector<4x4x128xf32>
    %cst_11 = arith.constant dense<0.000000e+00> : vector<4x4xf32>
    %22 = vector.multi_reduction <add>, %21, %cst_11 [2] : vector<4x4x128xf32> to vector<4x4xf32>
    %23 = vector.shape_cast %22 : vector<4x4xf32> to vector<1x4x4xf32>
    %24 = arith.addf %19, %23 : vector<1x4x4xf32>
    %c0_12 = arith.constant 0 : index
    %c0_13 = arith.constant 0 : index
    %c0_14 = arith.constant 0 : index
    %25 = vector.load %arg4[%c0_12, %c0_13, %c0_14] : memref<1x4x4xf32, #tpu.memory_space<vmem>>, vector<1x4x4xf32>
    tpu.vector_store %arg4[%c0_12, %c0_13, %c0_14], %24 {strides = array<i32>} : memref<1x4x4xf32, #tpu.memory_space<vmem>>, vector<1x4x4xf32>,
    %c0_15 = arith.constant 0 : index
    %c0_16 = arith.constant 0 : index
    %c0_17 = arith.constant 0 : index
    %26 = vector.load %arg5[%c0_15, %c0_16, %c0_17] : memref<1x4x4xf32, #tpu.memory_space<vmem>>, vector<1x4x4xf32>
    %cst_18 = arith.constant dense<0.000000e+00> : vector<4x4xf32>
    %27 = vector.multi_reduction <add>, %18, %cst_18 [2] : vector<4x4x128xf32> to vector<4x4xf32>
    %28 = vector.shape_cast %27 : vector<4x4xf32> to vector<1x4x4xf32>
    %29 = arith.addf %26, %28 : vector<1x4x4xf32>
    %c0_19 = arith.constant 0 : index
    %c0_20 = arith.constant 0 : index
    %c0_21 = arith.constant 0 : index
    %30 = vector.load %arg5[%c0_19, %c0_20, %c0_21] : memref<1x4x4xf32, #tpu.memory_space<vmem>>, vector<1x4x4xf32>
    tpu.vector_store %arg5[%c0_19, %c0_20, %c0_21], %29 {strides = array<i32>} : memref<1x4x4xf32, #tpu.memory_space<vmem>>, vector<1x4x4xf32>,
    %c0_22 = arith.constant 0 : index
    %c0_23 = arith.constant 0 : index
    %c0_24 = arith.constant 0 : index
    %31 = vector.load %arg6[%c0_22, %c0_23, %c0_24] : memref<1x4x1xf32, #tpu.memory_space<vmem>>, vector<1x4x1xf32>
    %cst_25 = arith.constant dense<0.000000e+00> : vector<4x1xf32>
    %32 = vector.multi_reduction <add>, %4, %cst_25 [2] : vector<4x1x128xf32> to vector<4x1xf32>
    %33 = vector.shape_cast %32 : vector<4x1xf32> to vector<1x4x1xf32>
    %34 = arith.addf %31, %33 : vector<1x4x1xf32>
    %c0_26 = arith.constant 0 : index
    %c0_27 = arith.constant 0 : index
    %c0_28 = arith.constant 0 : index
    %35 = vector.load %arg6[%c0_26, %c0_27, %c0_28] : memref<1x4x1xf32, #tpu.memory_space<vmem>>, vector<1x4x1xf32>
    tpu.vector_store %arg6[%c0_26, %c0_27, %c0_28], %34 {strides = array<i32>} : memref<1x4x1xf32, #tpu.memory_space<vmem>>, vector<1x4x1xf32>,
    return
  }
  func.func @transform_0(%arg0: i32, %arg1: i32) -> (i32, i32, i32) {
    %c1_i32 = arith.constant 1 : i32
    %0 = arith.muli %arg0, %c1_i32 : i32
    %1 = arith.addi %0, %arg1 : i32
    %c0_i32 = arith.constant 0 : i32
    %c0_i32_0 = arith.constant 0 : i32
    %c0_i32_1 = arith.constant 0 : i32
    return %c0_i32, %c0_i32_0, %1 : i32, i32, i32
  }
  func.func @transform_1(%arg0: i32, %arg1: i32) -> (i32, i32, i32) {
    %c1_i32 = arith.constant 1 : i32
    %0 = arith.muli %arg0, %c1_i32 : i32
    %1 = arith.addi %0, %arg1 : i32
    %c0_i32 = arith.constant 0 : i32
    %c0_i32_0 = arith.constant 0 : i32
    %c0_i32_1 = arith.constant 0 : i32
    return %c0_i32, %c0_i32_0, %1 : i32, i32, i32
  }
  func.func @transform_2(%arg0: i32, %arg1: i32) -> (i32, i32, i32) {
    %c0_i32 = arith.constant 0 : i32
    %c0_i32_0 = arith.constant 0 : i32
    %c0_i32_1 = arith.constant 0 : i32
    return %arg0, %c0_i32, %c0_i32_0 : i32, i32, i32
  }
  func.func @transform_3(%arg0: i32, %arg1: i32) -> (i32, i32, i32) {
    %c0_i32 = arith.constant 0 : i32
    %c0_i32_0 = arith.constant 0 : i32
    %c0_i32_1 = arith.constant 0 : i32
    return %arg0, %c0_i32, %c0_i32_0 : i32, i32, i32
  }
  func.func @transform_4(%arg0: i32, %arg1: i32) -> (i32, i32, i32) {
    %c0_i32 = arith.constant 0 : i32
    %c0_i32_0 = arith.constant 0 : i32
    %c0_i32_1 = arith.constant 0 : i32
    return %arg0, %c0_i32, %c0_i32_0 : i32, i32, i32
  }
}

</mosaic_0001>

<bundles_post_ra>
// kernel: tpu_custom_call.1
= control target key start
LH: loop header
LB: loop body
LE: loop exit
PB: predicated region body
PF: predicated region fallthrough
CT: control target
= control target key end

     0   :  { %s1417_s0 = inlined_call_operand.hbm [shape: f32[4,4,256], index: 0, kind: input, shape index: {}]   ;;  %s1418_s1 = inlined_call_operand.hbm [shape: f32[4,1,256], index: 1, kind: input, shape index: {}]   ;;  %s1419_s2 = inlined_call_operand.hbm [shape: f32[2,4,4], index: 2, kind: output, shape index: {0}]   ;;  %s1420_s3 = inlined_call_operand.hbm [shape: f32[2,4,4], index: 3, kind: output, shape index: {1}]   ;;  %s1421_s4 = inlined_call_operand.vmem [shape: f32[2,4,1], index: 4, kind: output, shape index: {2}]  }
   0x1   :  { %1424 = sst [smem:[#allocation14_spill]] %s1417_s0 }
   0x2   :  { %10 = vsyncpa [#allocation3], 0 }
   0x3   :  { %12 = vsyncpa [#allocation3 + $0x1], 0 }
   0x4   :  { %13 = vsyncpa [#allocation6], 0 }
   0x5   :  { %15 = vsyncpa [#allocation6 + $0x1], 0 }
   0x6   :  { %16 = vsyncpa [#allocation4], 0 }
   0x7   :  { %18 = vsyncpa [#allocation4 + $0x1], 0 }
   0x8   :  { %19 = vsyncpa [#allocation9], 0 }
   0x9   :  { %21 = vsyncpa [#allocation9 + $0x1], 0  ;;  %s1070_s15 = smov 0   ;;  %s1072_s16 = smov 0  }
   0xa   :  { %s1074_s17 = smov 0   ;;  %s1076_s18 = smov 0  }
   0xb   :  { %s1078_s19 = smov 0   ;;  %s1080_s20 = smov 0  }
   0xc LB: > { %s739_s21 = sadd.s32 4294967295, %s1032_s20   ;;  %s740_s22 = sadd.s32 4294967294, %s1032_s20   ;;  %s1032_s20 = sphi %s1080_s20, %s27_s20   ;;  %s1028_s19 = sphi %s1078_s19, %s1440_s19   ;;  %s1024_s18 = sphi %s1076_s18, %s1439_s18   ;;  %s1020_s17 = sphi %s1074_s17, %s1438_s17   ;;  %s1016_s16 = sphi %s1072_s16, %s1437_s16   ;;  %s1012_s15 = sphi %s1070_s15, %s1436_s15  }
   0xd   : > { %s39_s23 = sadd.s32 1, %s1028_s19  ;;  %s48_s24 = sadd.s32 1, %s1020_s17 }
   0xe   : > { %p41_p0 = scmp.ge.s32.totalorder %s39_s23, 2  ;;  %p55_p1 = scmp.ne.s32.totalorder %s1020_s17, %s1016_s16 }
   0xf   : > { %p56_p2 = scmp.eq.s32.totalorder %s1032_s20, 0  ;;  %p61_p3 = scmp.ne.s32.totalorder %s1016_s16, %s1012_s15 }
  0x10   : > { %s1442_s23 = smov (%p41_p0, %s39_s23), 0  ;;  %p62_p5 = scmp.eq.s32.totalorder %s739_s21, 0 }
  0x11   : > { %p1111_p4 = por %p56_p2, %p55_p1  ;;  %s45_s26 = ssub.s32 %s1028_s19, %s1442_s23 }
  0x12   : > { %p113_p6 = scmp.eq.s32.totalorder %s739_s21, 1  ;;  %p46_p7 = scmp.eq.s32.totalorder %s45_s26, 0 }
  0x13   : > { %p1117_p8 = por %p62_p5, %p61_p3  ;;  %p119_p10 = scmp.eq.s32.totalorder %s740_s22, 1 }
  0x14   : > { %p1121_p9 = por %p113_p6, %p55_p1  ;;  %p781_p13 = scmp.lt.s32.totalorder %s1032_s20, 2 }
  0x15   : > { %s1426_s27 = scalar_select %p1117_p8, 1, 0 }
  0x16   : > { %s1427_s28 = scalar_select %p1121_p9, 1, 0 }
  0x17   : > { %s1126_s29 = scalar_select %p46_p7, %s1020_s17, %s48_s24  }
  0x18   : > { %p1128_p11 = por %p119_p10, %p61_p3  ;;  %s1135_s5 = sand.u32 1, %s1020_s17  }
  0x19   : > { %s743_s6 = sshll.u32 %s1135_s5, 4  ;;  %s744_s7 = sshll.u32 %s1028_s19, 6 }
  0x1a   : > { %s1428_s30 = scalar_select %p1128_p11, 1, 0 }
  0x1b   : > { %s1429_s0 = sld [smem:[#allocation14_spill]]  ;;  %s195_s11 = scalar_lea.vmem [#allocation2], %s743_s6 }
  0x1c   : > { %s202_s12 = sshll.u32 %s195_s11, 4  ;;  %p1148_p0 = pnand %p781_p13, %p1111_p4  ;;  %s1144_s12 = int_to_ptr.vmem [resolvable:$true] %s202_s12 }
  0x1d   : > { %s192_s14 = scalar_lea.sflag [#allocation3], %s1135_s5 }
  0x1e   : > { %p856_p2 = pneg %p1148_p0 }
  0x21   : > { %s1142_s10 = scalar_lea.hbm %s1429_s0, %s744_s7  ;;  %s859_s26 = scalar_lea.hbm %s1429_s0, 512 }
  0x22   : > { %s854_s21 = scalar_lea.hbm %s1142_s10, 256  ;;  %p860_p4 = scmp.lt.u32.totalorder %s1142_s10, %s1429_s0 }
  0x23   : > { %p855_p1 = scmp.ne.s32.totalorder %s1142_s10, %s854_s21  ;;  %p861_p6 = scmp.lt.u32.totalorder %s859_s26, %s854_s21 }
  0x24   : > { %p863_p10 = scmp.lt.u32.totalorder %s854_s21, %s1142_s10 }
  0x25   : > { %p857_p3 = pnand %p856_p2, %p855_p1  ;;  %p862_p7 = por %p861_p6, %p860_p4 }
  0x27   : > { %p858_p5 = pneg %p857_p3  ;;  %p864_p13 = por %p863_p10, %p862_p7 }
  0x29   : > { %p865_p12 = pnand %p864_p13, %p858_p5 }
  0x2b   : > { %868 = shalt.err (!%p865_p12)
}
  0x2c   : > { %s869_s7 = scalar_lea.vmem %s1144_s12, 256  ;;  %s1034_s8 = smov [#allocation2]  }
  0x2d   : > { %p870_p1 = scmp.ne.s32.totalorder %s1144_s12, %s869_s7  ;;  %s874_s9 = sshll.u32 %s1034_s8, 4  ;;  %s875_s9 = int_to_ptr.vmem [resolvable:$false] %s874_s9 }
  0x2e   : > { %s876_s11 = scalar_lea.vmem %s875_s9, 512  ;;  %p877_p9 = scmp.lt.s32.totalorder %s1144_s12, %s875_s9 }
  0x2f   : > { %p872_p3 = pnand %p870_p1, %p856_p2  ;;  %p878_p4 = scmp.lt.s32.totalorder %s876_s11, %s869_s7 }
  0x31   : > { %p873_p11 = pneg %p872_p3  ;;  %p879_p6 = por %p878_p4, %p877_p9 }
  0x33   : > { %p880_p7 = pnand %p879_p6, %p873_p11 }
  0x35   : > { %883 = shalt.err (!%p880_p7)
}
  0x36   : > { %s1035_s21 = smov 128   ;;  %s1036_s22 = smov 64  }
  0x37   : > { %s1037_s24 = smov 4   ;;  %p747_p12 = scmp.ge.s32.totalorder %s1032_s20, 1 }
  0x38   : > { %770 = dma.hbm_to_vmem [thread:$0]  (!%p1148_p0), %s1142_s10, 256, %s1144_s12, %s192_s14, %s1035_s21, %s1036_s22, %s1037_s24  }
  0x39   : > { %p231_p9 = scmp.lt.s32.totalorder %s1032_s20, 3  ;;  %s745_s26 = sshll.u32 %s1135_s5, 2 }
  0x3a   : > { %s746_s6 = sshll.u32 %s1028_s19, 4  ;;  %s216_s7 = scalar_lea.vmem [#allocation5], %s745_s26 }
  0x3b   : > { %p1183_p11 = pnand %p747_p12, %p231_p9  ;;  %s223_s8 = sshll.u32 %s216_s7, 4  ;;  %s1193_s8 = int_to_ptr.vmem [resolvable:$true] %s223_s8 }
  0x3c   : > { %s1191_s0 = scalar_lea.hbm %s1418_s1, %s746_s6  ;;  %s213_s10 = scalar_lea.sflag [#allocation6], %s1135_s5 }
  0x3d   : > { %s884_s12 = scalar_lea.hbm %s1191_s0, 64  ;;  %s889_s22 = scalar_lea.hbm %s1418_s1, 128 }
  0x3e   : > { %p885_p5 = scmp.ne.s32.totalorder %s1191_s0, %s884_s12  ;;  %p890_p1 = scmp.lt.u32.totalorder %s1191_s0, %s1418_s1 }
  0x3f   : > { %p891_p3 = scmp.lt.u32.totalorder %s889_s22, %s884_s12  ;;  %p893_p6 = scmp.lt.u32.totalorder %s884_s12, %s1191_s0 }
  0x40   : > { %p887_p10 = pnand %p885_p5, %p856_p2 }
  0x41   : > { %p892_p4 = por %p891_p3, %p890_p1 }
  0x42   : > { %p888_p13 = pneg %p887_p10 }
  0x43   : > { %p894_p7 = por %p893_p6, %p892_p4 }
  0x45   : > { %p895_p12 = pnand %p894_p7, %p888_p13 }
  0x47   : > { %898 = shalt.err (!%p895_p12)
}
  0x48   : > { %s899_s6 = scalar_lea.vmem %s1193_s8, 64  ;;  %s1038_s7 = smov [#allocation5]  }
  0x49   : > { %p900_p9 = scmp.ne.s32.totalorder %s1193_s8, %s899_s6  ;;  %s904_s9 = sshll.u32 %s1038_s7, 4  ;;  %s905_s9 = int_to_ptr.vmem [resolvable:$false] %s904_s9 }
  0x4a   : > { %s906_s11 = scalar_lea.vmem %s905_s9, 128  ;;  %p907_p8 = scmp.lt.s32.totalorder %s1193_s8, %s905_s9 }
  0x4b   : > { %p902_p5 = pnand %p900_p9, %p856_p2  ;;  %p908_p1 = scmp.lt.s32.totalorder %s906_s11, %s899_s6 }
  0x4d   : > { %p903_p10 = pneg %p902_p5  ;;  %p909_p3 = por %p908_p1, %p907_p8 }
  0x4f   : > { %p910_p4 = pnand %p909_p3, %p903_p10 }
  0x51   : > { %913 = shalt.err (!%p910_p4)
}
  0x52   : > { %s1039_s12 = smov 32   ;;  %s1040_s14 = smov 16  }
  0x53   : > { %s1041_s21 = smov 1   ;;  %235 = sbr.rel (%p1183_p11) target bundleno = 359 (0x167), region = 28 }
  0x54   : > { %773 = dma.hbm_to_vmem [thread:$0]  (!%p1148_p0), %s1191_s0, 64, %s1193_s8, %s213_s10, %s1039_s12, %s1040_s14, %s1041_s21  }
  0x55   : > { %s1224_s22 = sand.u32 (!%p1183_p11), 1, %s1016_s16   ;;  %p1432_p8 = scmp.ne.s32.totalorder (!%p1183_p11), %s1426_s27, 0 }
  0x56   : > { %s748_s24 = sshll.u32 (!%p1183_p11), %s1224_s22, 4  ;;  %s238_s26 = scalar_lea.sflag (!%p1183_p11), [#allocation3], %s1224_s22 }
  0x57   : > { %s241_s6 = scalar_lea.vmem (!%p1183_p11), [#allocation2], %s748_s24 }
  0x5a   : > { %995 = dma.done.wait (%p1432_p8), %s238_s26, 256  }
  0x5b   : > { %997 = vsyncadd (%p1432_p8), %s238_s26, 4294967040  ;;  %s1233_s0 = sshll.u32 %s1224_s22, 2  ;;  %s247_s5 = scalar_lea.sflag [#allocation6], %s1224_s22 }
  0x5c   : > { %s1237_s13 = scalar_lea.vmem [#allocation5], %s1233_s0 }
  0x5d   : > { %999 = dma.done.wait (%p1432_p8), %s247_s5, 64  }
  0x5e   : > { %1001 = vsyncadd (%p1432_p8), %s247_s5, 4294967232  ;;  %v406_v0 = vlaneseq  ;;  %vm514_vm0 = vcmask 1040384   ;;  %vm312_vm1 = vcmask 1043456   ;;  %v1249_v4 = vld [vmem:[%s1237_s13 + $0x2] sm:$0x1]  ;;  %vm299_vm2 = vcmask 27648  }
  0x5f   : > { %v1252_v5 = vld [vmem:[%s1237_s13 + $0x1] sm:$0x1]  ;;  %v307_v6 = vld [vmem:[%s241_s6 + $0xc] sm:$0xf]  ;;  %v521_v7 = vsel %vm514_vm0, %v1249_v4, 0.0  ;;  %s1286_s27 = scalar_lea.vmem [#allocation8], %s1233_s0 }
  0x60   : > { %v1243_v1 = vshrl.u32 %v406_v0, 7  ;;  %v447_v2 = vand.u32 127, %v406_v0  ;;  %v518_v8 = vsel %vm514_vm0, %v1252_v5, 0.0  ;;  %v304_v9 = vld [vmem:[%s241_s6] sm:$0xf]  ;;  %522 = vadd.xlane.f32.xlu1 %v521_v7  ;;  %v334_v11 = vsel %vm312_vm1, %v307_v6, -inf }
  0x61   : > { %v305_v10 = vld [vmem:[%s241_s6 + $0x4] sm:$0xf]  ;;  %519 = vadd.xlane.f32.xlu0 %v518_v8  ;;  %v313_v12 = vsel %vm312_vm1, %v304_v9, -inf  ;;  %v335_v14 = vrot.slane %v334_v11, 4  ;;  %v306_v17 = vld [vmem:[%s241_s6 + $0x8] sm:$0xf] }
  0x62   : > { %v1246_v3 = vsub.s32 %v447_v2, %v1243_v1  ;;  %v320_v13 = vsel %vm312_vm1, %v305_v10, -inf  ;;  %v314_v15 = vrot.slane %v313_v12, 4  ;;  %v327_v18 = vsel %vm312_vm1, %v306_v17, -inf  ;;  %p291_p0 = scmp.lt.s32.totalorder %s1024_s18, 1  ;;  %s1293_s8 = scalar_lea.vmem [#allocation7], %s1233_s0 }
  0x63   : > { %v321_v16 = vrot.slane %v320_v13, 4  ;;  %v336_v19 = vmax.f32 %v334_v11, %v335_v14  ;;  %v328_v22 = vrot.slane %v327_v18, 4  ;;  %vm302_vm3 = vcmask 3072   ;;  %s755_s12 = sshll.u32 %s1024_s18, 6  ;;  %s577_s14 = sshll.u32 %s1286_s27, 4  ;;  %s1328_s14 = int_to_ptr.vmem [resolvable:$true] %s577_s14 }
  0x64   : > { %v315_v20 = vmax.f32 %v313_v12, %v314_v15  ;;  %s292_s25 = scalar_select %p291_p0, %s1024_s18, 1  ;;  %vm464_vm4 = vcmask 1041409   ;;  %vm466_vm5 = vcmask 1042434   ;;  %vm468_vm6 = vcmask 1043459  }
  0x65   : > { %v322_v21 = vmax.f32 %v320_v13, %v321_v16  ;;  %v337_v23 = vrot.slane %v336_v19, 2  ;;  %v329_v26 = vmax.f32 %v327_v18, %v328_v22  ;;  %s564_s21 = sshll.u32 %s1293_s8, 4  ;;  %s1326_s26 = scalar_lea.hbm %s1420_s3, %s755_s12  ;;  %s1340_s21 = int_to_ptr.vmem [resolvable:$true] %s564_s21 }
  0x66   : > { %v316_v24 = vrot.slane %v315_v20, 2  ;;  %s752_s10 = sshll.u32 %s292_s25, 2  ;;  %s1338_s5 = scalar_lea.hbm %s1419_s2, %s755_s12 }
  0x67   : > { %v323_v25 = vrot.slane %v322_v21, 2  ;;  %v338_v27 = vmax.f32 %v336_v19, %v337_v23  ;;  %v330_v30 = vrot.slane %v329_v26, 2  ;;  %s1300_s11 = scalar_lea.vmem %s1421_s4, %s752_s10  ;;  %s914_s25 = scalar_lea.vmem %s1328_s14, 64 }
  0x68   : > { %v317_v28 = vmax.f32 %v315_v20, %v316_v24  ;;  %v408_v24 = vsub.s32 0, %v1243_v1  ;;  %p915_p2 = scmp.ne.s32.totalorder %s1328_s14, %s914_s25  ;;  %p1433_p11 = scmp.ne.s32.totalorder %s1427_s28, 0 }
  0x69   : > { %v324_v29 = vmax.f32 %v322_v21, %v323_v25  ;;  %v339_v31 = vrot.slane %v338_v27, 1  ;;  %v331_v34 = vmax.f32 %v329_v26, %v330_v30  ;;  %s1043_s10 = smov [#allocation8]  }
  0x6a   : > { %v318_v32 = vrot.slane %v317_v28, 1  ;;  %p916_p13 = pnand %p915_p2, %p1433_p11  ;;  %s918_s7 = sshll.u32 %s1043_s10, 4  ;;  %s919_s7 = int_to_ptr.vmem [resolvable:$false] %s918_s7 }
  0x6b   : > { %v325_v33 = vrot.slane %v324_v29, 1  ;;  %v340_v35 = vmax.f32 %v338_v27, %v339_v31  ;;  %v332_v38 = vrot.slane %v331_v34, 1  ;;  %p921_p7 = scmp.lt.s32.totalorder %s1328_s14, %s919_s7 }
  0x6c   : > { %v319_v36 = vmax.f32 %v317_v28, %v318_v32  ;;  %p917_p6 = pneg %p916_p13 }
  0x6d   : > { %v326_v37 = vmax.f32 %v324_v29, %v325_v33  ;;  %v344_v39 = vsub.f32 %v307_v6, %v340_v35  ;;  %v333_v42 = vmax.f32 %v331_v34, %v332_v38  ;;  %v308_v29 = vld [vmem:[%s1237_s13] sm:$0x1] }
  0x6e   : > { %v341_v40 = vsub.f32 %v304_v9, %v319_v36  ;;  %v409_v35 = vrot.slane %v308_v29, %v408_v24 }
  0x6f   : > { %v342_v41 = vsub.f32 %v305_v10, %v326_v37  ;;  %v351_v43 = vmul.f32 1.442695, %v344_v39  ;;  %v343_v46 = vsub.f32 %v306_v17, %v333_v42  ;;  %v413_v37 = vrot.slane %v1252_v5, %v408_v24 }
  0x70   : > { %v345_v44 = vmul.f32 1.442695, %v341_v40 }
  0x71   : > { %v347_v45 = vmul.f32 1.442695, %v342_v41  ;;  %838 = vpow2.f32 %v351_v43  ;;  %v349_v47 = vmul.f32 1.442695, %v343_v46  ;;  %v311_v43 = vld [vmem:[%s1237_s13 + $0x3] sm:$0x1]  ;;  %v417_v46 = vrot.slane %v1249_v4, %v408_v24 }
  0x72   : > { %840 = vpow2.f32 %v345_v44  ;;  %s547_s13 = scalar_lea.sflag [#allocation9], %s1224_s22 }
  0x73   : > { %842 = vpow2.f32 %v347_v45 }
  0x74   : > { %844 = vpow2.f32 %v349_v47 }
  0x7b   : > { %v839_v48 = vpop.eup %838 }
  0x7c   : > { %v841_v49 = vpop.eup %840  ;;  %v374_v50 = vsel %vm312_vm1, %v839_v48, 0.0 }
  0x7d   : > { %v843_v51 = vpop.eup %842  ;;  %v375_v52 = vrot.slane %v374_v50, 4  ;;  %v353_v53 = vsel %vm312_vm1, %v841_v49, 0.0 }
  0x7e   : > { %v1264_v54 = vpop.eup %844  ;;  %v354_v55 = vrot.slane %v353_v53, 4  ;;  %v360_v56 = vsel %vm312_vm1, %v843_v51, 0.0 }
  0x7f   : > { %v376_v57 = vadd.f32 %v375_v52, %v374_v50  ;;  %v361_v58 = vrot.slane %v360_v56, 4  ;;  %v367_v59 = vsel %vm312_vm1, %v1264_v54, 0.0 }
  0x80   : > { %v355_v60 = vadd.f32 %v354_v55, %v353_v53  ;;  %v368_v61 = vrot.slane %v367_v59, 4 }
  0x81   : > { %v377_v62 = vrot.slane %v376_v57, 2  ;;  %v362_v63 = vadd.f32 %v361_v58, %v360_v56  ;;  %v1042_v58 = vmov 0.0  }
  0x82   : > { %v356_v0 = vrot.slane %v355_v60, 2  ;;  %v369_v2 = vadd.f32 %v368_v61, %v367_v59  ;;  %301 = vst.msk [vmem:[%s1286_s27] sm:$0xf] %vm299_vm2, %v1042_v58  ;;  %300 = vst.msk [vmem:[%s1293_s8] sm:$0xf] %vm299_vm2, %v1042_v58 }
  0x83   : > { %v378_v6 = vadd.f32 %v377_v62, %v376_v57  ;;  %v363_v7 = vrot.slane %v362_v63, 2  ;;  %v524_v57 = vsel %vm514_vm0, %v311_v43, 0.0  ;;  %303 = vst.msk [vmem:[%s1300_s11] sm:$0xf] %vm302_vm3, %v1042_v58 }
  0x84   : > { %v357_v8 = vadd.f32 %v356_v0, %v355_v60  ;;  %v370_v9 = vrot.slane %v369_v2, 2 }
  0x85   : > { %v379_v10 = vrot.slane %v378_v6, 1  ;;  %v364_v11 = vadd.f32 %v363_v7, %v362_v63 }
  0x86   : > { %v358_v12 = vrot.slane %v357_v8, 1  ;;  %v371_v13 = vadd.f32 %v370_v9, %v369_v2 }
  0x87   : > { %v380_v14 = vadd.f32 %v379_v10, %v378_v6  ;;  %v365_v15 = vrot.slane %v364_v11, 1 }
  0x88   : > { %v359_v16 = vadd.f32 %v358_v12, %v357_v8  ;;  %v372_v17 = vrot.slane %v371_v13, 1 }
  0x89   : > { %846 = vrcp.f32 %v380_v14  ;;  %v366_v18 = vadd.f32 %v365_v15, %v364_v11 }
  0x8a   : > { %848 = vrcp.f32 %v359_v16  ;;  %v373_v19 = vadd.f32 %v372_v17, %v371_v13  ;;  %v474_v13 = vld [vmem:[%s1286_s27] sm:$0xf] }
  0x8b   : > { %850 = vrcp.f32 %v366_v18 }
  0x8c   : > { %852 = vrcp.f32 %v373_v19 }
  0x93   : > { %v847_v20 = vpop.eup %846 }
  0x94   : > { %v849_v21 = vpop.eup %848  ;;  %v388_v22 = vmul.f32 %v847_v20, %v380_v14 }
  0x95   : > { %v851_v23 = vpop.eup %850  ;;  %v385_v25 = vmul.f32 %v849_v21, %v359_v16 }
  0x96   : > { %v853_v26 = vpop.eup %852  ;;  %v392_v27 = vsub.f32 2.0, %v388_v22  ;;  %v386_v28 = vmul.f32 %v851_v23, %v366_v18  ;;  %v401_v22 = vld [vmem:[%s1293_s8] sm:$0xf] }
  0x97   : > { %v389_v30 = vsub.f32 2.0, %v385_v25  ;;  %v387_v31 = vmul.f32 %v853_v26, %v373_v19 }
  0x98   : > { %v396_v32 = vmul.f32 %v847_v20, %v392_v27  ;;  %v390_v33 = vsub.f32 2.0, %v386_v28 }
  0x99   : > { %v393_v34 = vmul.f32 %v849_v21, %v389_v30  ;;  %v391_v36 = vsub.f32 2.0, %v387_v31 }
  0x9a   : > { %v400_v38 = vmul.f32 %v839_v48, %v396_v32  ;;  %v394_v39 = vmul.f32 %v851_v23, %v390_v33 }
  0x9b   : > { %v397_v40 = vmul.f32 %v841_v49, %v393_v34  ;;  %v395_v41 = vmul.f32 %v853_v26, %v391_v36  ;;  %v421_v49 = vrot.slane %v311_v43, %v408_v24 }
  0x9c   : > { %v484_v1 = vsel %vm312_vm1, %v400_v38, 0.0  ;;  %v398_v42 = vmul.f32 %v843_v51, %v394_v39 }
  0x9d   : > { %485 = vadd.xlane.f32.xlu0 %v484_v1  ;;  %v475_v44 = vsel %vm312_vm1, %v397_v40, 0.0  ;;  %v426_v45 = vmul.f32 %v409_v35, %v397_v40  ;;  %v399_v48 = vmul.f32 %v1264_v54, %v395_v41  ;;  %v429_v55 = vmul.f32 %v421_v49, %v400_v38 }
  0x9e   : > { %476 = vadd.xlane.f32.xlu1 %v475_v44  ;;  %v427_v47 = vmul.f32 %v413_v37, %v398_v42  ;;  %v478_v50 = vsel %vm312_vm1, %v398_v42, 0.0  ;;  %v515_v54 = vsel %vm514_vm0, %v308_v29, 0.0 }
  0x9f   : > { %v430_v5 = vsel %vm312_vm1, %v426_v45, 0.0  ;;  %v428_v52 = vmul.f32 %v417_v46, %v399_v48  ;;  %v481_v53 = vsel %vm312_vm1, %v399_v48, 0.0  ;;  %v439_v56 = vsel %vm312_vm1, %v429_v55, 0.0 }
  0xa0   : > { %v433_v51 = vsel %vm312_vm1, %v427_v47, 0.0 }
  0xa1   : > { %431 = vadd.xlane.f32.xlu0 %v430_v5  ;;  %v436_v4 = vsel %vm312_vm1, %v428_v52, 0.0 }
  0xa2   : > { %479 = vadd.xlane.f32.xlu1 %v478_v50 }
  0xa5   : > { %434 = vadd.xlane.f32.xlu0 %v433_v51 }
  0xa6   : > { %482 = vadd.xlane.f32.xlu1 %v481_v53 }
  0xa9   : > { %437 = vadd.xlane.f32.xlu0 %v436_v4 }
  0xaa   : > { %440 = vadd.xlane.f32.xlu1 %v439_v56 }
  0xad   : > { %516 = vadd.xlane.f32.xlu0 %v515_v54 }
  0xae   : > { %525 = vadd.xlane.f32.xlu1 %v524_v57 }
  0xed   : > { %v1304_v60 = vpop.xlane.xlu1 %522 }
  0xee   : > { %v520_v59 = vpop.xlane.xlu0 %519 }
  0xef   : > { %v531_v24 = vrot.slane %v520_v59, 7 }
 0x12a   : > { %v486_v61 = vpop.xlane.xlu0 %485 }
 0x12b   : > { %v477_v62 = vpop.xlane.xlu1 %476  ;;  %v506_v11 = vrot.slane %v486_v61, %v1246_v3 }
 0x12c   : > { %v494_v7 = vrot.slane %v477_v62, %v1246_v3 }
 0x12e   : > { %v432_v63 = vpop.xlane.xlu0 %431 }
 0x12f   : > { %v480_v0 = vpop.xlane.xlu1 %479  ;;  %v451_v14 = vrot.slane %v432_v63, %v1246_v3 }
 0x130   : > { %v498_v2 = vrot.slane %v480_v0, %v1246_v3 }
 0x132   : > { %v435_v6 = vpop.xlane.xlu0 %434  ;;  %v507_v12 = vsel %vm464_vm4, %v498_v2, %v494_v7 }
 0x133   : > { %v483_v8 = vpop.xlane.xlu1 %482  ;;  %v455_v10 = vrot.slane %v435_v6, %v1246_v3 }
 0x134   : > { %v502_v9 = vrot.slane %v483_v8, %v1246_v3 }
 0x135   : > { %v465_v21 = vsel %vm464_vm4, %v455_v10, %v451_v14 }
 0x136   : > { %v438_v15 = vpop.xlane.xlu0 %437  ;;  %v508_v16 = vsel %vm466_vm5, %v502_v9, %v507_v12 }
 0x137   : > { %v441_v17 = vpop.xlane.xlu1 %440  ;;  %v459_v18 = vrot.slane %v438_v15, %v1246_v3  ;;  %v509_v19 = vsel %vm468_vm6, %v506_v11, %v508_v16 }
 0x138   : > { %v463_v20 = vrot.slane %v441_v17, %v1246_v3  ;;  %v511_v23 = vadd.f32 %v509_v19, %v474_v13  ;;  %v533_v3 = vrot.slane %v1304_v60, 6 }
 0x139   : > { %v467_v25 = vsel %vm466_vm5, %v459_v18, %v465_v21 }
 0x13a   : > { %v469_v26 = vsel %vm468_vm6, %v463_v20, %v467_v25  ;;  %v517_v27 = vpop.xlane.xlu0 %516  ;;  %512 = vst.msk [vmem:[%s1286_s27] sm:$0xf] %vm299_vm2, %v511_v23  ;;  %s920_s27 = scalar_lea.vmem %s919_s7, 128 }
 0x13b   : > { %v526_v28 = vpop.xlane.xlu1 %525  ;;  %v471_v29 = vadd.f32 %v469_v26, %v401_v22  ;;  %v532_v30 = vsel %vm464_vm4, %v531_v24, %v517_v27  ;;  %p922_p12 = scmp.lt.s32.totalorder %s920_s27, %s914_s25 }
 0x13d   : > { %p923_p9 = por %p922_p12, %p921_p7 }
 0x13f   : > { %p924_p5 = pnand %p923_p9, %p917_p6 }
 0x141   : > { %927 = shalt.err (!%p924_p5)
}
 0x142   : > { %s928_s9 = scalar_lea.hbm %s1326_s26, 64  ;;  %s932_s24 = scalar_lea.hbm %s1420_s3, 128 }
 0x143   : > { %p929_p10 = scmp.ne.s32.totalorder %s1326_s26, %s928_s9  ;;  %p933_p4 = scmp.lt.u32.totalorder %s1326_s26, %s1420_s3 }
 0x144   : > { %p934_p8 = scmp.lt.u32.totalorder %s932_s24, %s928_s9  ;;  %p936_p2 = scmp.lt.u32.totalorder %s928_s9, %s1326_s26 }
 0x145   : > { %p930_p1 = pnand %p929_p10, %p1433_p11 }
 0x146   : > { %p935_p0 = por %p934_p8, %p933_p4 }
 0x147   : > { %p931_p3 = pneg %p930_p1 }
 0x148   : > { %p937_p13 = por %p936_p2, %p935_p0 }
 0x14a   : > { %p938_p6 = pnand %p937_p13, %p931_p3 }
 0x14c   : > { %941 = shalt.err (!%p938_p6)
}
 0x14d   : > { %764 = dma.vmem_to_hbm [thread:$0]  (%p1433_p11), %s1328_s14, 64, %s1326_s26, %s547_s13   ;;  %v535_v31 = vrot.slane %v526_v28, 5  ;;  %v513_v32 = vld [vmem:[%s1300_s11] sm:$0xf]  ;;  %v534_v33 = vsel %vm466_vm5, %v533_v3, %v532_v30  ;;  %473 = vst.msk [vmem:[%s1293_s8] sm:$0xf] %vm299_vm2, %v471_v29 }
 0x14e   : > { %s542_s25 = scalar_lea.sflag [#allocation4], %s1224_s22  ;;  %s942_s10 = scalar_lea.vmem %s1340_s21, 64 }
 0x14f   : > { %v536_v34 = vsel %vm468_vm6, %v535_v31, %v534_v33  ;;  %p943_p7 = scmp.ne.s32.totalorder %s1340_s21, %s942_s10  ;;  %s1044_s7 = smov [#allocation7]  }
 0x150   : > { %s946_s27 = sshll.u32 %s1044_s7, 4  ;;  %s947_s27 = int_to_ptr.vmem [resolvable:$false] %s946_s27 }
 0x151   : > { %p944_p12 = pnand %p943_p7, %p1433_p11  ;;  %s948_s9 = scalar_lea.vmem %s947_s27, 128 }
 0x152   : > { %p949_p5 = scmp.lt.s32.totalorder %s1340_s21, %s947_s27  ;;  %p950_p10 = scmp.lt.s32.totalorder %s948_s9, %s942_s10 }
 0x153   : > { %p945_p9 = pneg %p944_p12 }
 0x154   : > { %p951_p1 = por %p950_p10, %p949_p5 }
 0x156   : > { %p952_p3 = pnand %p951_p1, %p945_p9 }
 0x158   : > { %955 = shalt.err (!%p952_p3)
}
 0x159   : > { %s956_s22 = scalar_lea.hbm %s1338_s5, 64  ;;  %s960_s26 = scalar_lea.hbm %s1419_s2, 128 }
 0x15a   : > { %p957_p4 = scmp.ne.s32.totalorder %s1338_s5, %s956_s22  ;;  %p961_p2 = scmp.lt.u32.totalorder %s1338_s5, %s1419_s2 }
 0x15b   : > { %p962_p13 = scmp.lt.u32.totalorder %s960_s26, %s956_s22  ;;  %p964_p7 = scmp.lt.u32.totalorder %s956_s22, %s1338_s5 }
 0x15c   : > { %p958_p8 = pnand %p957_p4, %p1433_p11 }
 0x15d   : > { %p963_p6 = por %p962_p13, %p961_p2 }
 0x15e   : > { %p959_p0 = pneg %p958_p8 }
 0x15f   : > { %p965_p12 = por %p964_p7, %p963_p6 }
 0x161   : > { %p966_p9 = pnand %p965_p12, %p959_p0 }
 0x163   : > { %969 = shalt.err (!%p966_p9)
}
 0x164   : > { %763 = dma.vmem_to_hbm [thread:$0]  (%p1433_p11), %s1340_s21, 64, %s1338_s5, %s542_s25   ;;  %v538_v35 = vadd.f32 %v536_v34, %v513_v32 }
 0x166   : > { %540 = vst.msk [vmem:[%s1300_s11] sm:$0xf] %vm302_vm3, %v538_v35 }
 0x167 PF: > { %s592_s18 = sand.u32 1, %s1012_s15   ;;  %p1434_p5 = scmp.ne.s32.totalorder %s1428_s30, 0 }
 0x168   : > { %p1435_p10 = scmp.ge.s32.totalorder %s1032_s20, 2  ;;  %s593_s24 = scalar_lea.sflag [#allocation4], %s592_s18 }
 0x16a   : > { %p775_p1 = pnand %p1435_p10, %p1434_p5 }
 0x16c   : > { %1003 = dma.done.wait (!%p775_p1), %s593_s24, 64  }
 0x16d   : > { %1005 = vsyncadd (!%p775_p1), %s593_s24, 4294967232  ;;  %s602_s6 = scalar_lea.sflag [#allocation9], %s592_s18 }
 0x16e   : > { %1007 = dma.done.wait (!%p775_p1), %s602_s6, 64  }
 0x16f   : > { %1009 = vsyncadd (!%p775_p1), %s602_s6, 4294967232  ;;  %s27_s20 = sadd.s32 1, %s1032_s20   ;;  %s1436_s15 = smov %s1016_s16 }
 0x170   : > { %p24_p11 = scmp.ge.s32.totalorder %s27_s20, 4   ;;  %s1437_s16 = smov %s1020_s17 }
 0x171   : > { %s1438_s17 = smov %s1126_s29  ;;  %s1439_s18 = smov %s1028_s19 }
 0x172   : > { %s1440_s19 = smov %s1442_s23  ;;  %26 = sbr.rel (!%p24_p11) target bundleno = 12 (0xc), region = 119 }
 0x179   :  { %614 = vsyncpa [#allocation3], 1 }
 0x17a   :  { %616 = vsyncpa [#allocation3 + $0x1], 1 }
 0x17b   :  { %617 = vsyncpa [#allocation6], 1 }
 0x17c   :  { %619 = vsyncpa [#allocation6 + $0x1], 1 }
 0x17d   :  { %620 = vsyncpa [#allocation4], 1 }
 0x17e   :  { %622 = vsyncpa [#allocation4 + $0x1], 1 }
 0x17f   :  { %623 = vsyncpa [#allocation9], 1 }
 0x180   :  { %625 = vsyncpa [#allocation9 + $0x1], 1 }

</bundles_post_ra>
